<compile_context>
chip_gen: v6e
topology: v6e:2x2x1
jax: 0.10.0
libtpu: 0.0.40
codegen_flags: <defaults>
</compile_context>

<pallas_src>
import math

import jax
import jax.numpy as jnp
from jax.experimental import pallas as pl
from jax.experimental.pallas import tpu as pltpu


def _round_up(x, m):
    return ((x + m - 1) // m) * m


def _embed_gather_kernel(scale, block_tokens, vocab, ring):
    """Gather `block_tokens` rows of the HBM table into VMEM, scale, store."""

    def kernel(ids_ref, tab_hbm, o_ref, buf, sems):
        base = pl.program_id(0) * block_tokens

        def row_of(t):
            # Clamp like jnp.take(mode="clip"); also guards against OOB DMA.
            return jnp.clip(ids_ref[base + t], 0, vocab - 1)

        def start(t):
            pltpu.make_async_copy(
                tab_hbm.at[pl.ds(row_of(t), 1), :],
                buf.at[pl.ds(t, 1), :],
                sems.at[t % ring],
            ).start()

        def wait(t):
            # Source index is a dummy: wait() only needs the dst shape + sem.
            pltpu.make_async_copy(
                tab_hbm.at[pl.ds(0, 1), :],
                buf.at[pl.ds(t, 1), :],
                sems.at[t % ring],
            ).wait()

        # Prime the DMA ring (static Python loop; `ring` is small).
        for t in range(ring):
            start(t)

        # Keep `ring` row copies in flight while draining in order.
        @pl.loop(0, block_tokens)
        def _(t):
            wait(t)

            @pl.when(t + ring < block_tokens)
            def _():
                start(t + ring)

        # Single lane-dense full-tile store; scale applied once in f32.
        o_ref[...] = (buf[...].astype(jnp.float32) * scale).astype(o_ref.dtype)

    return kernel


def input_embeddings(ids, table, *, block_tokens=None):
    """ids: integer token ids (any shape). table: (vocab_size, d_model)."""
    vocab, d_model = table.shape
    scale = math.sqrt(float(d_model))

    orig_shape = ids.shape
    flat = ids.reshape(-1).astype(jnp.int32)
    n = flat.shape[0]

    if block_tokens is None:
        # Big blocks amortize the ~0.35us per-grid-step overhead; cap at the
        # (8-aligned) token count so tiny inputs keep a single small block.
        block_tokens = min(512, _round_up(n, 8))
    block_tokens = max(8, _round_up(block_tokens, 8))

    n_pad = _round_up(n, block_tokens)
    if n_pad != n:
        # TODO(synk): mask the last block in-kernel instead of pad+slice to
        # avoid the extra full-output HBM copy for non-aligned token counts.
        flat = jnp.pad(flat, (0, n_pad - n))
    grid = (n_pad // block_tokens,)

    ring = min(8, block_tokens)  # in-flight row DMAs per block

    itemsize = table.dtype.itemsize
    cost = pl.CostEstimate(
        flops=n_pad * d_model,                       # the sqrt(d_model) scale
        transcendentals=0,
        bytes_accessed=n_pad * 4                     # token ids
        + n_pad * d_model * itemsize                 # gathered table rows
        + n_pad * d_model * itemsize,                # output
    )

    # VMEM: gather scratch (x1) + double-buffered output tile; the table is
    # never VMEM-resident, so this stays tiny even on v7x's 64 MiB per-TC.
    vmem_needed = 3 * block_tokens * d_model * itemsize
    vmem_limit = min(max(2 * vmem_needed, 4 << 20), 48 << 20)

    out = pl.pallas_call(
        _embed_gather_kernel(scale, block_tokens, vocab, ring),
        out_shape=jax.ShapeDtypeStruct((n_pad, d_model), table.dtype),
        grid_spec=pltpu.PrefetchScalarGridSpec(
            num_scalar_prefetch=1,                   # token ids -> SMEM
            grid=grid,
            in_specs=[pl.BlockSpec(memory_space=pl.ANY)],   # table stays in HBM
            out_specs=pl.BlockSpec((block_tokens, d_model),
                                   lambda b, ids: (b, 0)),
            scratch_shapes=[
                pltpu.VMEM((block_tokens, d_model), table.dtype),
                pltpu.SemaphoreType.DMA((ring,)),
            ],
        ),
        compiler_params=pltpu.CompilerParams(
            dimension_semantics=("parallel",),
            vmem_limit_bytes=vmem_limit,
        ),
        cost_estimate=cost,
    )(flat, table)

    if n_pad != n:
        out = out[:n]
    return out.reshape(*orig_shape, d_model)


if __name__ == "__main__":
    B, S = 2, 8
    vocab_size, d_model = 64, 128   # d_model multiple of 128 -> lane-dense stores

    key = jax.random.PRNGKey(0)
    k_ids, k_tab = jax.random.split(key)
    x = jax.random.randint(k_ids, (B, S), 0, vocab_size, dtype=jnp.int32)
    table = jax.random.normal(k_tab, (vocab_size, d_model), dtype=jnp.float32)

    # block_tokens=8 -> grid=(2,): >=2 row blocks so v7x megacore gets work.
    out = input_embeddings(x, table, block_tokens=8)
    out = jax.block_until_ready(out)

    ref = jnp.take(table, x, axis=0) * math.sqrt(d_model)
    assert out.shape == (B, S, d_model)
    assert jnp.allclose(out, ref, atol=1e-5, rtol=1e-5), "mismatch vs reference"
    print("KERNEL_OK")
</pallas_src>

<mosaic_0001>
module attributes {stable_mosaic.version = 11 : i64} {
  func.func @kernel(%arg0: i32, %arg1: memref<16xi32, #tpu.memory_space<smem>>, %arg2: memref<64x128xf32, #tpu.memory_space<any>>, %arg3: memref<8x128xf32, #tpu.memory_space<vmem>>, %arg4: memref<8x128xf32, #tpu.memory_space<vmem>>, %arg5: memref<8x!tpu.dma_semaphore, #tpu.memory_space<semaphore_mem>>) attributes {dimension_semantics = [#tpu.dimension_semantics<parallel>], iteration_bounds = array<i64: 2>, scalar_prefetch = 1 : i64, scratch_operands = 2 : i64, tpu.core_type = #tpu.core_type<tc>, window_params = [{}, {transform_indices = @transform_1, window_bounds = array<i64: 8, 128>}]} {
    %c8_i32 = arith.constant 8 : i32
    %0 = arith.muli %arg0, %c8_i32 : i32
    %c0_i32 = arith.constant 0 : i32
    %1 = arith.addi %0, %c0_i32 : i32
    %2 = arith.index_cast %1 : i32 to index
    %3 = memref.load %arg1[%2] : memref<16xi32, #tpu.memory_space<smem>>
    %c0_i32_0 = arith.constant 0 : i32
    %c63_i32 = arith.constant 63 : i32
    %4 = arith.maxsi %c0_i32_0, %3 : i32
    %5 = arith.minsi %c63_i32, %4 : i32
    %c0_i32_1 = arith.constant 0 : i32
    %c0_i32_2 = arith.constant 0 : i32
    %6 = tpu.memref_slice %arg2[%5, %c0_i32_2] : memref<64x128xf32, #tpu.memory_space<any>> -> memref<1x128xf32, #tpu.memory_space<any>>
    %c0_i32_3 = arith.constant 0 : i32
    %c0_i32_4 = arith.constant 0 : i32
    %7 = tpu.memref_slice %arg4[%c0_i32_3, %c0_i32_4] : memref<8x128xf32, #tpu.memory_space<vmem>> -> memref<1x128xf32, #tpu.memory_space<vmem>>
    %8 = tpu.memref_slice %arg5[%c0_i32_1] : memref<8x!tpu.dma_semaphore, #tpu.memory_space<semaphore_mem>> -> memref<1x!tpu.dma_semaphore, #tpu.memory_space<semaphore_mem>>
    %9 = tpu.memref_squeeze %8 : memref<1x!tpu.dma_semaphore, #tpu.memory_space<semaphore_mem>> -> memref<!tpu.dma_semaphore, #tpu.memory_space<semaphore_mem>>
    tpu.enqueue_dma source(%6 : memref<1x128xf32, #tpu.memory_space<any>>) target(%7 : memref<1x128xf32, #tpu.memory_space<vmem>>) target_semaphore(%9 : memref<!tpu.dma_semaphore, #tpu.memory_space<semaphore_mem>>)
    %c1_i32 = arith.constant 1 : i32
    %10 = arith.addi %0, %c1_i32 : i32
    %11 = arith.index_cast %10 : i32 to index
    %12 = memref.load %arg1[%11] : memref<16xi32, #tpu.memory_space<smem>>
    %c0_i32_5 = arith.constant 0 : i32
    %c63_i32_6 = arith.constant 63 : i32
    %13 = arith.maxsi %c0_i32_5, %12 : i32
    %14 = arith.minsi %c63_i32_6, %13 : i32
    %c1_i32_7 = arith.constant 1 : i32
    %c0_i32_8 = arith.constant 0 : i32
    %15 = tpu.memref_slice %arg2[%14, %c0_i32_8] : memref<64x128xf32, #tpu.memory_space<any>> -> memref<1x128xf32, #tpu.memory_space<any>>
    %c1_i32_9 = arith.constant 1 : i32
    %c0_i32_10 = arith.constant 0 : i32
    %16 = tpu.memref_slice %arg4[%c1_i32_9, %c0_i32_10] : memref<8x128xf32, #tpu.memory_space<vmem>> -> memref<1x128xf32, #tpu.memory_space<vmem>>
    %17 = tpu.memref_slice %arg5[%c1_i32_7] : memref<8x!tpu.dma_semaphore, #tpu.memory_space<semaphore_mem>> -> memref<1x!tpu.dma_semaphore, #tpu.memory_space<semaphore_mem>>
    %18 = tpu.memref_squeeze %17 : memref<1x!tpu.dma_semaphore, #tpu.memory_space<semaphore_mem>> -> memref<!tpu.dma_semaphore, #tpu.memory_space<semaphore_mem>>
    tpu.enqueue_dma source(%15 : memref<1x128xf32, #tpu.memory_space<any>>) target(%16 : memref<1x128xf32, #tpu.memory_space<vmem>>) target_semaphore(%18 : memref<!tpu.dma_semaphore, #tpu.memory_space<semaphore_mem>>)
    %c2_i32 = arith.constant 2 : i32
    %19 = arith.addi %0, %c2_i32 : i32
    %20 = arith.index_cast %19 : i32 to index
    %21 = memref.load %arg1[%20] : memref<16xi32, #tpu.memory_space<smem>>
    %c0_i32_11 = arith.constant 0 : i32
    %c63_i32_12 = arith.constant 63 : i32
    %22 = arith.maxsi %c0_i32_11, %21 : i32
    %23 = arith.minsi %c63_i32_12, %22 : i32
    %c2_i32_13 = arith.constant 2 : i32
    %c0_i32_14 = arith.constant 0 : i32
    %24 = tpu.memref_slice %arg2[%23, %c0_i32_14] : memref<64x128xf32, #tpu.memory_space<any>> -> memref<1x128xf32, #tpu.memory_space<any>>
    %c2_i32_15 = arith.constant 2 : i32
    %c0_i32_16 = arith.constant 0 : i32
    %25 = tpu.memref_slice %arg4[%c2_i32_15, %c0_i32_16] : memref<8x128xf32, #tpu.memory_space<vmem>> -> memref<1x128xf32, #tpu.memory_space<vmem>>
    %26 = tpu.memref_slice %arg5[%c2_i32_13] : memref<8x!tpu.dma_semaphore, #tpu.memory_space<semaphore_mem>> -> memref<1x!tpu.dma_semaphore, #tpu.memory_space<semaphore_mem>>
    %27 = tpu.memref_squeeze %26 : memref<1x!tpu.dma_semaphore, #tpu.memory_space<semaphore_mem>> -> memref<!tpu.dma_semaphore, #tpu.memory_space<semaphore_mem>>
    tpu.enqueue_dma source(%24 : memref<1x128xf32, #tpu.memory_space<any>>) target(%25 : memref<1x128xf32, #tpu.memory_space<vmem>>) target_semaphore(%27 : memref<!tpu.dma_semaphore, #tpu.memory_space<semaphore_mem>>)
    %c3_i32 = arith.constant 3 : i32
    %28 = arith.addi %0, %c3_i32 : i32
    %29 = arith.index_cast %28 : i32 to index
    %30 = memref.load %arg1[%29] : memref<16xi32, #tpu.memory_space<smem>>
    %c0_i32_17 = arith.constant 0 : i32
    %c63_i32_18 = arith.constant 63 : i32
    %31 = arith.maxsi %c0_i32_17, %30 : i32
    %32 = arith.minsi %c63_i32_18, %31 : i32
    %c3_i32_19 = arith.constant 3 : i32
    %c0_i32_20 = arith.constant 0 : i32
    %33 = tpu.memref_slice %arg2[%32, %c0_i32_20] : memref<64x128xf32, #tpu.memory_space<any>> -> memref<1x128xf32, #tpu.memory_space<any>>
    %c3_i32_21 = arith.constant 3 : i32
    %c0_i32_22 = arith.constant 0 : i32
    %34 = tpu.memref_slice %arg4[%c3_i32_21, %c0_i32_22] : memref<8x128xf32, #tpu.memory_space<vmem>> -> memref<1x128xf32, #tpu.memory_space<vmem>>
    %35 = tpu.memref_slice %arg5[%c3_i32_19] : memref<8x!tpu.dma_semaphore, #tpu.memory_space<semaphore_mem>> -> memref<1x!tpu.dma_semaphore, #tpu.memory_space<semaphore_mem>>
    %36 = tpu.memref_squeeze %35 : memref<1x!tpu.dma_semaphore, #tpu.memory_space<semaphore_mem>> -> memref<!tpu.dma_semaphore, #tpu.memory_space<semaphore_mem>>
    tpu.enqueue_dma source(%33 : memref<1x128xf32, #tpu.memory_space<any>>) target(%34 : memref<1x128xf32, #tpu.memory_space<vmem>>) target_semaphore(%36 : memref<!tpu.dma_semaphore, #tpu.memory_space<semaphore_mem>>)
    %c4_i32 = arith.constant 4 : i32
    %37 = arith.addi %0, %c4_i32 : i32
    %38 = arith.index_cast %37 : i32 to index
    %39 = memref.load %arg1[%38] : memref<16xi32, #tpu.memory_space<smem>>
    %c0_i32_23 = arith.constant 0 : i32
    %c63_i32_24 = arith.constant 63 : i32
    %40 = arith.maxsi %c0_i32_23, %39 : i32
    %41 = arith.minsi %c63_i32_24, %40 : i32
    %c4_i32_25 = arith.constant 4 : i32
    %c0_i32_26 = arith.constant 0 : i32
    %42 = tpu.memref_slice %arg2[%41, %c0_i32_26] : memref<64x128xf32, #tpu.memory_space<any>> -> memref<1x128xf32, #tpu.memory_space<any>>
    %c4_i32_27 = arith.constant 4 : i32
    %c0_i32_28 = arith.constant 0 : i32
    %43 = tpu.memref_slice %arg4[%c4_i32_27, %c0_i32_28] : memref<8x128xf32, #tpu.memory_space<vmem>> -> memref<1x128xf32, #tpu.memory_space<vmem>>
    %44 = tpu.memref_slice %arg5[%c4_i32_25] : memref<8x!tpu.dma_semaphore, #tpu.memory_space<semaphore_mem>> -> memref<1x!tpu.dma_semaphore, #tpu.memory_space<semaphore_mem>>
    %45 = tpu.memref_squeeze %44 : memref<1x!tpu.dma_semaphore, #tpu.memory_space<semaphore_mem>> -> memref<!tpu.dma_semaphore, #tpu.memory_space<semaphore_mem>>
    tpu.enqueue_dma source(%42 : memref<1x128xf32, #tpu.memory_space<any>>) target(%43 : memref<1x128xf32, #tpu.memory_space<vmem>>) target_semaphore(%45 : memref<!tpu.dma_semaphore, #tpu.memory_space<semaphore_mem>>)
    %c5_i32 = arith.constant 5 : i32
    %46 = arith.addi %0, %c5_i32 : i32
    %47 = arith.index_cast %46 : i32 to index
    %48 = memref.load %arg1[%47] : memref<16xi32, #tpu.memory_space<smem>>
    %c0_i32_29 = arith.constant 0 : i32
    %c63_i32_30 = arith.constant 63 : i32
    %49 = arith.maxsi %c0_i32_29, %48 : i32
    %50 = arith.minsi %c63_i32_30, %49 : i32
    %c5_i32_31 = arith.constant 5 : i32
    %c0_i32_32 = arith.constant 0 : i32
    %51 = tpu.memref_slice %arg2[%50, %c0_i32_32] : memref<64x128xf32, #tpu.memory_space<any>> -> memref<1x128xf32, #tpu.memory_space<any>>
    %c5_i32_33 = arith.constant 5 : i32
    %c0_i32_34 = arith.constant 0 : i32
    %52 = tpu.memref_slice %arg4[%c5_i32_33, %c0_i32_34] : memref<8x128xf32, #tpu.memory_space<vmem>> -> memref<1x128xf32, #tpu.memory_space<vmem>>
    %53 = tpu.memref_slice %arg5[%c5_i32_31] : memref<8x!tpu.dma_semaphore, #tpu.memory_space<semaphore_mem>> -> memref<1x!tpu.dma_semaphore, #tpu.memory_space<semaphore_mem>>
    %54 = tpu.memref_squeeze %53 : memref<1x!tpu.dma_semaphore, #tpu.memory_space<semaphore_mem>> -> memref<!tpu.dma_semaphore, #tpu.memory_space<semaphore_mem>>
    tpu.enqueue_dma source(%51 : memref<1x128xf32, #tpu.memory_space<any>>) target(%52 : memref<1x128xf32, #tpu.memory_space<vmem>>) target_semaphore(%54 : memref<!tpu.dma_semaphore, #tpu.memory_space<semaphore_mem>>)
    %c6_i32 = arith.constant 6 : i32
    %55 = arith.addi %0, %c6_i32 : i32
    %56 = arith.index_cast %55 : i32 to index
    %57 = memref.load %arg1[%56] : memref<16xi32, #tpu.memory_space<smem>>
    %c0_i32_35 = arith.constant 0 : i32
    %c63_i32_36 = arith.constant 63 : i32
    %58 = arith.maxsi %c0_i32_35, %57 : i32
    %59 = arith.minsi %c63_i32_36, %58 : i32
    %c6_i32_37 = arith.constant 6 : i32
    %c0_i32_38 = arith.constant 0 : i32
    %60 = tpu.memref_slice %arg2[%59, %c0_i32_38] : memref<64x128xf32, #tpu.memory_space<any>> -> memref<1x128xf32, #tpu.memory_space<any>>
    %c6_i32_39 = arith.constant 6 : i32
    %c0_i32_40 = arith.constant 0 : i32
    %61 = tpu.memref_slice %arg4[%c6_i32_39, %c0_i32_40] : memref<8x128xf32, #tpu.memory_space<vmem>> -> memref<1x128xf32, #tpu.memory_space<vmem>>
    %62 = tpu.memref_slice %arg5[%c6_i32_37] : memref<8x!tpu.dma_semaphore, #tpu.memory_space<semaphore_mem>> -> memref<1x!tpu.dma_semaphore, #tpu.memory_space<semaphore_mem>>
    %63 = tpu.memref_squeeze %62 : memref<1x!tpu.dma_semaphore, #tpu.memory_space<semaphore_mem>> -> memref<!tpu.dma_semaphore, #tpu.memory_space<semaphore_mem>>
    tpu.enqueue_dma source(%60 : memref<1x128xf32, #tpu.memory_space<any>>) target(%61 : memref<1x128xf32, #tpu.memory_space<vmem>>) target_semaphore(%63 : memref<!tpu.dma_semaphore, #tpu.memory_space<semaphore_mem>>)
    %c7_i32 = arith.constant 7 : i32
    %64 = arith.addi %0, %c7_i32 : i32
    %65 = arith.index_cast %64 : i32 to index
    %66 = memref.load %arg1[%65] : memref<16xi32, #tpu.memory_space<smem>>
    %c0_i32_41 = arith.constant 0 : i32
    %c63_i32_42 = arith.constant 63 : i32
    %67 = arith.maxsi %c0_i32_41, %66 : i32
    %68 = arith.minsi %c63_i32_42, %67 : i32
    %c7_i32_43 = arith.constant 7 : i32
    %c0_i32_44 = arith.constant 0 : i32
    %69 = tpu.memref_slice %arg2[%68, %c0_i32_44] : memref<64x128xf32, #tpu.memory_space<any>> -> memref<1x128xf32, #tpu.memory_space<any>>
    %c7_i32_45 = arith.constant 7 : i32
    %c0_i32_46 = arith.constant 0 : i32
    %70 = tpu.memref_slice %arg4[%c7_i32_45, %c0_i32_46] : memref<8x128xf32, #tpu.memory_space<vmem>> -> memref<1x128xf32, #tpu.memory_space<vmem>>
    %71 = tpu.memref_slice %arg5[%c7_i32_43] : memref<8x!tpu.dma_semaphore, #tpu.memory_space<semaphore_mem>> -> memref<1x!tpu.dma_semaphore, #tpu.memory_space<semaphore_mem>>
    %72 = tpu.memref_squeeze %71 : memref<1x!tpu.dma_semaphore, #tpu.memory_space<semaphore_mem>> -> memref<!tpu.dma_semaphore, #tpu.memory_space<semaphore_mem>>
    tpu.enqueue_dma source(%69 : memref<1x128xf32, #tpu.memory_space<any>>) target(%70 : memref<1x128xf32, #tpu.memory_space<vmem>>) target_semaphore(%72 : memref<!tpu.dma_semaphore, #tpu.memory_space<semaphore_mem>>)
    %c0_i32_47 = arith.constant 0 : i32
    %c8_i32_48 = arith.constant 8 : i32
    %73 = arith.addi %c0_i32_47, %c8_i32_48 : i32
    %c1_i32_49 = arith.constant 1 : i32
    scf.for %arg6 = %c0_i32_47 to %73 step %c1_i32_49  : i32 {
      %c1_i32_54 = arith.constant 1 : i32
      %78 = arith.muli %arg6, %c1_i32_54 : i32
      %c0_i32_55 = arith.constant 0 : i32
      %79 = arith.addi %c0_i32_55, %78 : i32
      %c8_i32_56 = arith.constant 8 : i32
      %c0_i32_57 = arith.constant 0 : i32
      %80 = arith.cmpi eq, %c8_i32_56, %c0_i32_57 : i32
      %c1_i32_58 = arith.constant 1 : i32
      %81 = arith.select %80, %c1_i32_58, %c8_i32_56 : i32
      %82 = arith.remsi %79, %81 : i32
      %c0_i32_59 = arith.constant 0 : i32
      %83 = arith.cmpi ne, %82, %c0_i32_59 : i32
      %c0_i32_60 = arith.constant 0 : i32
      %84 = arith.cmpi slt, %82, %c0_i32_60 : i32
      %c0_i32_61 = arith.constant 0 : i32
      %85 = arith.cmpi slt, %81, %c0_i32_61 : i32
      %86 = arith.xori %84, %85 : i1
      %87 = arith.andi %86, %83 : i1
      %88 = arith.addi %82, %81 : i32
      %89 = arith.select %87, %88, %82 : i32
      %c0_i32_62 = arith.constant 0 : i32
      %c0_i32_63 = arith.constant 0 : i32
      %90 = tpu.memref_slice %arg2[%c0_i32_62, %c0_i32_63] : memref<64x128xf32, #tpu.memory_space<any>> -> memref<1x128xf32, #tpu.memory_space<any>>
      %c0_i32_64 = arith.constant 0 : i32
      %91 = tpu.memref_slice %arg4[%79, %c0_i32_64] : memref<8x128xf32, #tpu.memory_space<vmem>> -> memref<1x128xf32, #tpu.memory_space<vmem>>
      %92 = tpu.memref_slice %arg5[%89] : memref<8x!tpu.dma_semaphore, #tpu.memory_space<semaphore_mem>> -> memref<1x!tpu.dma_semaphore, #tpu.memory_space<semaphore_mem>>
      %93 = tpu.memref_squeeze %92 : memref<1x!tpu.dma_semaphore, #tpu.memory_space<semaphore_mem>> -> memref<!tpu.dma_semaphore, #tpu.memory_space<semaphore_mem>>
      tpu.wait_dma2 semaphore(%93 : memref<!tpu.dma_semaphore, #tpu.memory_space<semaphore_mem>>) src(%90 : memref<1x128xf32, #tpu.memory_space<any>>) dst(%91 : memref<1x128xf32, #tpu.memory_space<vmem>>)
      %c8_i32_65 = arith.constant 8 : i32
      %94 = arith.addi %79, %c8_i32_65 : i32
      %c8_i32_66 = arith.constant 8 : i32
      %95 = arith.cmpi slt, %94, %c8_i32_66 : i32
      %96 = arith.extui %95 : i1 to i32
      %c0_i32_67 = arith.constant 0 : i32
      %97 = arith.cmpi ne, %96, %c0_i32_67 : i32
      scf.if %97 {
        %c8_i32_68 = arith.constant 8 : i32
        %98 = arith.addi %79, %c8_i32_68 : i32
        %99 = arith.addi %0, %98 : i32
        %100 = arith.index_cast %99 : i32 to index
        %101 = memref.load %arg1[%100] : memref<16xi32, #tpu.memory_space<smem>>
        %c0_i32_69 = arith.constant 0 : i32
        %c63_i32_70 = arith.constant 63 : i32
        %102 = arith.maxsi %c0_i32_69, %101 : i32
        %103 = arith.minsi %c63_i32_70, %102 : i32
        %c8_i32_71 = arith.constant 8 : i32
        %c0_i32_72 = arith.constant 0 : i32
        %104 = arith.cmpi eq, %c8_i32_71, %c0_i32_72 : i32
        %c1_i32_73 = arith.constant 1 : i32
        %105 = arith.select %104, %c1_i32_73, %c8_i32_71 : i32
        %106 = arith.remsi %98, %105 : i32
        %c0_i32_74 = arith.constant 0 : i32
        %107 = arith.cmpi ne, %106, %c0_i32_74 : i32
        %c0_i32_75 = arith.constant 0 : i32
        %108 = arith.cmpi slt, %106, %c0_i32_75 : i32
        %c0_i32_76 = arith.constant 0 : i32
        %109 = arith.cmpi slt, %105, %c0_i32_76 : i32
        %110 = arith.xori %108, %109 : i1
        %111 = arith.andi %110, %107 : i1
        %112 = arith.addi %106, %105 : i32
        %113 = arith.select %111, %112, %106 : i32
        %c0_i32_77 = arith.constant 0 : i32
        %114 = tpu.memref_slice %arg2[%103, %c0_i32_77] : memref<64x128xf32, #tpu.memory_space<any>> -> memref<1x128xf32, #tpu.memory_space<any>>
        %c0_i32_78 = arith.constant 0 : i32
        %115 = tpu.memref_slice %arg4[%98, %c0_i32_78] : memref<8x128xf32, #tpu.memory_space<vmem>> -> memref<1x128xf32, #tpu.memory_space<vmem>>
        %116 = tpu.memref_slice %arg5[%113] : memref<8x!tpu.dma_semaphore, #tpu.memory_space<semaphore_mem>> -> memref<1x!tpu.dma_semaphore, #tpu.memory_space<semaphore_mem>>
        %117 = tpu.memref_squeeze %116 : memref<1x!tpu.dma_semaphore, #tpu.memory_space<semaphore_mem>> -> memref<!tpu.dma_semaphore, #tpu.memory_space<semaphore_mem>>
        tpu.enqueue_dma source(%114 : memref<1x128xf32, #tpu.memory_space<any>>) target(%115 : memref<1x128xf32, #tpu.memory_space<vmem>>) target_semaphore(%117 : memref<!tpu.dma_semaphore, #tpu.memory_space<semaphore_mem>>)
      } else {
      }
    }
    %c8_i32_50 = arith.constant 8 : i32
    %c0 = arith.constant 0 : index
    %c0_51 = arith.constant 0 : index
    %74 = vector.load %arg4[%c0, %c0_51] : memref<8x128xf32, #tpu.memory_space<vmem>>, vector<8x128xf32>
    %cst = arith.constant 11.3137083 : f32
    %75 = vector.broadcast %cst : f32 to vector<8x128xf32>
    %76 = arith.mulf %74, %75 : vector<8x128xf32>
    %c0_52 = arith.constant 0 : index
    %c0_53 = arith.constant 0 : index
    %77 = vector.load %arg3[%c0_52, %c0_53] : memref<8x128xf32, #tpu.memory_space<vmem>>, vector<8x128xf32>
    tpu.vector_store %arg3[%c0_52, %c0_53], %76 {strides = array<i32>} : memref<8x128xf32, #tpu.memory_space<vmem>>, vector<8x128xf32>,
    return
  }
  func.func @transform_1(%arg0: i32, %arg1: memref<16xi32, #tpu.memory_space<smem>>) -> (i32, i32) {
    %c0_i32 = arith.constant 0 : i32
    %c0_i32_0 = arith.constant 0 : i32
    return %arg0, %c0_i32 : i32, i32
  }
}

</mosaic_0001>

<bundles_post_ra>
// kernel: tpu_custom_call.1
= control target key start
LH: loop header
LB: loop body
LE: loop exit
PB: predicated region body
PF: predicated region fallthrough
CT: control target
= control target key end

     0   :  { %s845_s9 = smov [#allocation5]   ;;  %s1159_s0 = inlined_call_operand.hbm [shape: s32[16], index: 0, kind: input, shape index: {}]   ;;  %s1160_s1 = inlined_call_operand.hbm [shape: f32[64,128], index: 1, kind: input, shape index: {}]   ;;  %s1161_s2 = inlined_call_operand.hbm [shape: f32[16,128], index: 2, kind: output, shape index: {}]  }
   0x1   :  { %8 = dma.hbm_to_smem %s1159_s0, 16, %s845_s9, [#allocation4] }
   0x2   :  { %821 = dma.done.wait [#allocation4], 16 }
   0x3   :  { %822 = vsyncadd [#allocation4], 4294967280 }
   0x4   :  { %10 = sfence }
   0x5   :  { %11 = vsyncpa [#allocation7], 0 }
   0x6   :  { %13 = vsyncpa [#allocation7 + $0x1], 0  ;;  %s873_s12 = smov 0   ;;  %s875_s13 = smov 0  }
   0x7   :  { %s877_s14 = smov 0  }
   0x8 LB: > { %s420_s0 = sadd.s32 4294967295, %s839_s14   ;;  %s890_s15 = sadd.s32 1, %s839_s14   ;;  %s839_s14 = sphi %s877_s14, %s1169_s14   ;;  %s835_s13 = sphi %s875_s13, %s1168_s13   ;;  %s831_s12 = sphi %s873_s12, %s1167_s12  }
   0x9   : > { %s22_s16 = ssub.s32 %s839_s14, %s890_s15  ;;  %s25_s17 = sadd.s32 1, %s835_s13 }
   0xa   : > { %p23_p0 = scmp.eq.s32.totalorder %s22_s16, 0  ;;  %p421_p1 = scmp.ne.s32.totalorder %s22_s16, 0 }
   0xb   : > { %p29_p2 = scmp.eq.s32.totalorder %s839_s14, 1  ;;  %p34_p3 = scmp.ne.s32.totalorder %s835_s13, %s831_s12 }
   0xc   : > { %s899_s18 = scalar_select %p23_p0, %s835_s13, %s25_s17  }
   0xd   : > { %p901_p4 = por %p421_p1, %p29_p2  ;;  %p35_p5 = scmp.eq.s32.totalorder %s420_s0, 1 }
   0xe   : > { %p422_p7 = scmp.ge.s32.totalorder %s839_s14, 2 }
   0xf   : > { %p905_p6 = por %p35_p5, %p34_p3  ;;  %s49_s21 = sand.u32 (!%p422_p7), 1, %s835_s13  }
  0x10   : > { %44 = sbr.rel (%p422_p7) target bundleno = 285 (0x11d), region = 12  ;;  %s912_s22 = sshll.u32 (!%p422_p7), %s839_s14, 3 }
  0x11   : > { %s1163_s20 = scalar_select %p905_p6, 1, 0 }
  0x12   : > { %s916_s23 = sshll.u32 (!%p422_p7), %s49_s21, 3  ;;  %s53_s24 = sld [smem:[#allocation5 + %s912_s22]] (!%p422_p7) }
  0x13   : > { %s846_s25 = smov (!%p422_p7), [#allocation2]   ;;  %s71_s27 = sadd.s32 (!%p422_p7), 1, %s912_s22 }
  0x14   : > { %s67_s26 = sshll.u32 (!%p422_p7), %s846_s25, 4  ;;  %s922_s28 = sld [smem:[#allocation5 + %s71_s27]] (!%p422_p7)  ;;  %s920_s26 = int_to_ptr.vmem [resolvable:$true] %s67_s26 }
  0x15   : > { %s92_s29 = sadd.s32 2, %s912_s22  ;;  %s847_s30 = smov [#allocation2 + $0x1]  }
  0x16   : > { %s88_s3 = sshll.u32 %s847_s30, 4  ;;  %s925_s4 = sld [smem:[#allocation5 + %s92_s29]]  ;;  %s927_s3 = int_to_ptr.vmem [resolvable:$true] %s88_s3 }
  0x17   : > { %s940_s16 = scalar_lea.hbm %s1160_s1, 1024 }
  0x18   : > { %p54_p8 = scmp.gt.s32.totalorder %s53_s24, 0  ;;  %p425_p9 = scmp.lt.s32.totalorder %s53_s24, 63 }
  0x1a   : > { %s1171_s24 = smov (!%p54_p8, %s53_s24), 0  ;;  %p73_p10 = scmp.gt.s32.totalorder %s922_s28, 0 }
  0x1b   : > { %p431_p11 = scmp.lt.s32.totalorder %s922_s28, 63  ;;  %s1173_s24 = smov (!%p425_p9, %s1171_s24), 63 }
  0x1c   : > { %s74_s5 = scalar_select %p73_p10, %s922_s28, 0 }
  0x1d   : > { %s430_s6 = sshll.u32 %s1173_s24, 4  ;;  %p94_p12 = scmp.gt.s32.totalorder %s925_s4, 0 }
  0x1e   : > { %s59_s9 = scalar_lea.hbm %s1160_s1, %s430_s6 }
  0x1f   : > { %s577_s10 = scalar_lea.hbm %s59_s9, 16  ;;  %p580_p1 = scmp.lt.s32.totalorder %s59_s9, %s1160_s1 }
  0x20   : > { %p578_p0 = scmp.ne.s32.totalorder %s59_s9, %s577_s10  ;;  %p581_p2 = scmp.lt.s32.totalorder %s940_s16, %s577_s10 }
  0x22   : > { %p582_p3 = por %p581_p2, %p580_p1 }
  0x24   : > { %p583_p5 = pnand %p582_p3, %p578_p0 }
  0x26   : > { %586 = shalt.err (!%p583_p5)  }
  0x27   : > { %s587_s24 = scalar_lea.vmem %s920_s26, 16  ;;  %s949_s27 = scalar_lea.vmem %s920_s26, 128 }
  0x28   : > { %p588_p7 = scmp.ne.s32.totalorder %s920_s26, %s587_s24  ;;  %p592_p8 = scmp.lt.s32.totalorder %s920_s26, %s920_s26 }
  0x29   : > { %p593_p9 = scmp.lt.s32.totalorder %s949_s27, %s587_s24 }
  0x2b   : > { %p594_p10 = por %p593_p9, %p592_p8 }
  0x2d   : > { %p595_p13 = pnand %p594_p10, %p588_p7 }
  0x2f   : > { %598 = shalt.err (!%p595_p13)  }
  0x30   : > { %70 = dma.hbm_to_vmem [thread:$0]  %s59_s9, 16, %s920_s26, [#allocation3] }
  0x31   : > { %s1175_s5 = smov (!%p431_p11, %s74_s5), 63  ;;  %s848_s6 = smov [#allocation2 + $0x2]  }
  0x32   : > { %s95_s29 = scalar_select %p94_p12, %s925_s4, 0 }
  0x33   : > { %s436_s30 = sshll.u32 %s1175_s5, 4  ;;  %s109_s7 = sshll.u32 %s848_s6, 4  ;;  %s963_s7 = int_to_ptr.vmem [resolvable:$true] %s109_s7 }
  0x34   : > { %s78_s11 = scalar_lea.hbm %s1160_s1, %s436_s30 }
  0x35   : > { %s599_s0 = scalar_lea.hbm %s78_s11, 16  ;;  %p602_p0 = scmp.lt.s32.totalorder %s78_s11, %s1160_s1 }
  0x36   : > { %p600_p13 = scmp.ne.s32.totalorder %s78_s11, %s599_s0  ;;  %p603_p1 = scmp.lt.s32.totalorder %s940_s16, %s599_s0 }
  0x38   : > { %p604_p2 = por %p603_p1, %p602_p0 }
  0x3a   : > { %p605_p11 = pnand %p604_p2, %p600_p13 }
  0x3c   : > { %608 = shalt.err (!%p605_p11)  }
  0x3d   : > { %s609_s28 = scalar_lea.vmem %s927_s3, 16  ;;  %p614_p3 = scmp.lt.s32.totalorder %s927_s3, %s920_s26 }
  0x3e   : > { %p610_p12 = scmp.ne.s32.totalorder %s927_s3, %s609_s28  ;;  %p615_p5 = scmp.lt.s32.totalorder %s949_s27, %s609_s28 }
  0x40   : > { %p616_p7 = por %p615_p5, %p614_p3 }
  0x42   : > { %p617_p8 = pnand %p616_p7, %p610_p12 }
  0x44   : > { %620 = shalt.err (!%p617_p8)  }
  0x45   : > { %91 = dma.hbm_to_vmem [thread:$0]  %s78_s11, 16, %s927_s3, [#allocation3 + $0x1] }
  0x46   : > { %p1164_p9 = scmp.lt.s32.totalorder %s925_s4, 63  ;;  %s113_s5 = sadd.s32 3, %s912_s22 }
  0x47   : > { %s978_s24 = sld [smem:[#allocation5 + %s113_s5]] }
  0x48   : > { %s1177_s29 = smov (!%p1164_p9, %s95_s29), 63 }
  0x49   : > { %s442_s9 = sshll.u32 %s1177_s29, 4 }
  0x4a   : > { %s99_s8 = scalar_lea.hbm %s1160_s1, %s442_s9 }
  0x4b   : > { %s621_s10 = scalar_lea.hbm %s99_s8, 16  ;;  %p624_p13 = scmp.lt.s32.totalorder %s99_s8, %s1160_s1 }
  0x4c   : > { %p622_p10 = scmp.ne.s32.totalorder %s99_s8, %s621_s10  ;;  %p625_p0 = scmp.lt.s32.totalorder %s940_s16, %s621_s10 }
  0x4e   : > { %p626_p1 = por %p625_p0, %p624_p13 }
  0x50   : > { %p627_p2 = pnand %p626_p1, %p622_p10 }
  0x52   : > { %630 = shalt.err (!%p627_p2)  }
  0x53   : > { %s631_s3 = scalar_lea.vmem %s963_s7, 16  ;;  %p636_p12 = scmp.lt.s32.totalorder %s963_s7, %s920_s26 }
  0x54   : > { %p632_p11 = scmp.ne.s32.totalorder %s963_s7, %s631_s3  ;;  %p637_p3 = scmp.lt.s32.totalorder %s949_s27, %s631_s3 }
  0x56   : > { %p638_p5 = por %p637_p3, %p636_p12 }
  0x58   : > { %p639_p7 = pnand %p638_p5, %p632_p11 }
  0x5a   : > { %642 = shalt.err (!%p639_p7)  }
  0x5b   : > { %112 = dma.hbm_to_vmem [thread:$0]  %s99_s8, 16, %s963_s7, [#allocation3 + $0x2] }
  0x5c   : > { %s849_s4 = smov [#allocation2 + $0x3]   ;;  %s134_s11 = sadd.s32 4, %s912_s22 }
  0x5d   : > { %s130_s29 = sshll.u32 %s849_s4, 4  ;;  %s994_s25 = sld [smem:[#allocation5 + %s134_s11]]  ;;  %s131_s29 = int_to_ptr.vmem [resolvable:$true] %s130_s29 }
  0x5e   : > { %s850_s28 = smov [#allocation2 + $0x4]   ;;  %s155_s9 = sadd.s32 5, %s912_s22 }
  0x5f   : > { %s151_s5 = sshll.u32 %s850_s28, 4  ;;  %p115_p8 = scmp.gt.s32.totalorder %s978_s24, 0  ;;  %s1002_s5 = int_to_ptr.vmem [resolvable:$true] %s151_s5 }
  0x60   : > { %p443_p9 = scmp.lt.s32.totalorder %s978_s24, 63  ;;  %s999_s30 = sld [smem:[#allocation5 + %s155_s9]] }
  0x61   : > { %s1179_s24 = smov (!%p115_p8, %s978_s24), 0  ;;  %s176_s7 = sadd.s32 6, %s912_s22 }
  0x62   : > { %s1181_s24 = smov (!%p443_p9, %s1179_s24), 63 }
  0x63   : > { %p136_p10 = scmp.gt.s32.totalorder %s994_s25, 0  ;;  %s448_s6 = sshll.u32 %s1181_s24, 4 }
  0x64   : > { %s120_s0 = scalar_lea.hbm %s1160_s1, %s448_s6 }
  0x65   : > { %s643_s17 = scalar_lea.hbm %s120_s0, 16  ;;  %p646_p2 = scmp.lt.s32.totalorder %s120_s0, %s1160_s1 }
  0x66   : > { %p157_p0 = scmp.gt.s32.totalorder %s999_s30, 0  ;;  %p644_p1 = scmp.ne.s32.totalorder %s120_s0, %s643_s17 }
  0x67   : > { %p647_p11 = scmp.lt.s32.totalorder %s940_s16, %s643_s17 }
  0x69   : > { %p648_p12 = por %p647_p11, %p646_p2 }
  0x6b   : > { %p649_p3 = pnand %p648_p12, %p644_p1 }
  0x6d   : > { %652 = shalt.err (!%p649_p3)  }
  0x6e   : > { %s653_s11 = scalar_lea.vmem %s131_s29, 16  ;;  %p658_p7 = scmp.lt.s32.totalorder %s131_s29, %s920_s26 }
  0x6f   : > { %p654_p5 = scmp.ne.s32.totalorder %s131_s29, %s653_s11  ;;  %p659_p8 = scmp.lt.s32.totalorder %s949_s27, %s653_s11 }
  0x71   : > { %p660_p9 = por %p659_p8, %p658_p7 }
  0x73   : > { %p661_p13 = pnand %p660_p9, %p654_p5 }
  0x75   : > { %664 = shalt.err (!%p661_p13)  }
  0x76   : > { %133 = dma.hbm_to_vmem [thread:$0]  %s120_s0, 16, %s131_s29, [#allocation3 + $0x3] }
  0x77   : > { %s137_s24 = scalar_select %p136_p10, %s994_s25, 0 }
  0x78   : > { %s158_s28 = scalar_select %p157_p0, %s999_s30, 0 }
  0x79   : > { %p1165_p1 = scmp.lt.s32.totalorder %s994_s25, 63  ;;  %p455_p2 = scmp.lt.s32.totalorder %s999_s30, 63 }
  0x7a   : > { %s851_s9 = smov [#allocation2 + $0x5]   ;;  %s1026_s10 = sld [smem:[#allocation5 + %s176_s7]] }
  0x7b   : > { %s1183_s24 = smov (!%p1165_p1, %s137_s24), 63  ;;  %s172_s6 = sshll.u32 %s851_s9, 4  ;;  %s173_s6 = int_to_ptr.vmem [resolvable:$true] %s172_s6 }
  0x7c   : > { %s454_s8 = sshll.u32 %s1183_s24, 4 }
  0x7d   : > { %s141_s17 = scalar_lea.hbm %s1160_s1, %s454_s8 }
  0x7e   : > { %s665_s3 = scalar_lea.hbm %s141_s17, 16  ;;  %p668_p10 = scmp.lt.s32.totalorder %s141_s17, %s1160_s1 }
  0x7f   : > { %p666_p13 = scmp.ne.s32.totalorder %s141_s17, %s665_s3  ;;  %p669_p11 = scmp.lt.s32.totalorder %s940_s16, %s665_s3 }
  0x81   : > { %p670_p0 = por %p669_p11, %p668_p10 }
  0x83   : > { %p671_p12 = pnand %p670_p0, %p666_p13 }
  0x85   : > { %674 = shalt.err (!%p671_p12)  }
  0x86   : > { %s675_s25 = scalar_lea.vmem %s1002_s5, 16  ;;  %p680_p5 = scmp.lt.s32.totalorder %s1002_s5, %s920_s26 }
  0x87   : > { %p676_p3 = scmp.ne.s32.totalorder %s1002_s5, %s675_s25  ;;  %p681_p7 = scmp.lt.s32.totalorder %s949_s27, %s675_s25 }
  0x89   : > { %p682_p8 = por %p681_p7, %p680_p5 }
  0x8b   : > { %p683_p9 = pnand %p682_p8, %p676_p3 }
  0x8d   : > { %686 = shalt.err (!%p683_p9)  }
  0x8e   : > { %154 = dma.hbm_to_vmem [thread:$0]  %s141_s17, 16, %s1002_s5, [#allocation3 + $0x4] }
  0x8f   : > { %s1185_s28 = smov (!%p455_p2, %s158_s28), 63  ;;  %s852_s7 = smov [#allocation2 + $0x6]  }
  0x90   : > { %s193_s24 = sshll.u32 %s852_s7, 4  ;;  %s460_s9 = sshll.u32 %s1185_s28, 4  ;;  %s194_s24 = int_to_ptr.vmem [resolvable:$true] %s193_s24 }
  0x91   : > { %s197_s8 = sadd.s32 7, %s912_s22  ;;  %s162_s3 = scalar_lea.hbm %s1160_s1, %s460_s9 }
  0x92   : > { %p178_p1 = scmp.gt.s32.totalorder %s1026_s10, 0  ;;  %s687_s4 = scalar_lea.hbm %s162_s3, 16 }
  0x93   : > { %p688_p13 = scmp.ne.s32.totalorder %s162_s3, %s687_s4  ;;  %p690_p10 = scmp.lt.s32.totalorder %s162_s3, %s1160_s1 }
  0x94   : > { %p691_p11 = scmp.lt.s32.totalorder %s940_s16, %s687_s4 }
  0x96   : > { %p692_p0 = por %p691_p11, %p690_p10 }
  0x98   : > { %p693_p12 = pnand %p692_p0, %p688_p13 }
  0x9a   : > { %696 = shalt.err (!%p693_p12)  }
  0x9b   : > { %s697_s5 = scalar_lea.vmem %s173_s6, 16  ;;  %p702_p3 = scmp.lt.s32.totalorder %s173_s6, %s920_s26 }
  0x9c   : > { %p698_p2 = scmp.ne.s32.totalorder %s173_s6, %s697_s5  ;;  %p703_p5 = scmp.lt.s32.totalorder %s949_s27, %s697_s5 }
  0x9e   : > { %p704_p7 = por %p703_p5, %p702_p3 }
  0xa0   : > { %p705_p8 = pnand %p704_p7, %p698_p2 }
  0xa2   : > { %708 = shalt.err (!%p705_p8)  }
  0xa3   : > { %175 = dma.hbm_to_vmem [thread:$0]  %s162_s3, 16, %s173_s6, [#allocation3 + $0x5] }
  0xa4   : > { %s179_s30 = scalar_select %p178_p1, %s1026_s10, 0 }
  0xa5   : > { %p461_p9 = scmp.lt.s32.totalorder %s1026_s10, 63  ;;  %s198_s28 = sld [smem:[#allocation5 + %s197_s8]] }
  0xa7   : > { %s1187_s30 = smov (!%p461_p9, %s179_s30), 63 }
  0xa8   : > { %s466_s17 = sshll.u32 %s1187_s30, 4 }
  0xa9   : > { %s183_s29 = scalar_lea.hbm %s1160_s1, %s466_s17 }
  0xaa   : > { %s709_s0 = scalar_lea.hbm %s183_s29, 16  ;;  %p712_p10 = scmp.lt.s32.totalorder %s183_s29, %s1160_s1 }
  0xab   : > { %p710_p13 = scmp.ne.s32.totalorder %s183_s29, %s709_s0  ;;  %p713_p11 = scmp.lt.s32.totalorder %s940_s16, %s709_s0 }
  0xad   : > { %p714_p0 = por %p713_p11, %p712_p10 }
  0xaf   : > { %p715_p12 = pnand %p714_p0, %p710_p13 }
  0xb1   : > { %718 = shalt.err (!%p715_p12)  }
  0xb2   : > { %s719_s6 = scalar_lea.vmem %s194_s24, 16  ;;  %p724_p2 = scmp.lt.s32.totalorder %s194_s24, %s920_s26 }
  0xb3   : > { %p720_p1 = scmp.ne.s32.totalorder %s194_s24, %s719_s6  ;;  %p725_p3 = scmp.lt.s32.totalorder %s949_s27, %s719_s6 }
  0xb5   : > { %p726_p5 = por %p725_p3, %p724_p2 }
  0xb7   : > { %p727_p7 = pnand %p726_p5, %p720_p1 }
  0xb9   : > { %730 = shalt.err (!%p727_p7)  }
  0xba   : > { %196 = dma.hbm_to_vmem [thread:$0]  %s183_s29, 16, %s194_s24, [#allocation3 + $0x6] }
  0xbb   : > { %p199_p8 = scmp.gt.s32.totalorder %s198_s28, 0  ;;  %p467_p9 = scmp.lt.s32.totalorder %s198_s28, 63 }
  0xbc   : > { %s853_s10 = smov [#allocation2 + $0x7]  }
  0xbd   : > { %s214_s8 = sshll.u32 %s853_s10, 4  ;;  %s1189_s28 = smov (!%p199_p8, %s198_s28), 0  ;;  %s215_s8 = int_to_ptr.vmem [resolvable:$true] %s214_s8 }
  0xbe   : > { %s1191_s28 = smov (!%p467_p9, %s1189_s28), 63 }
  0xbf   : > { %s472_s3 = sshll.u32 %s1191_s28, 4 }
  0xc0   : > { %s204_s30 = scalar_lea.hbm %s1160_s1, %s472_s3 }
  0xc1   : > { %s731_s17 = scalar_lea.hbm %s204_s30, 16  ;;  %p734_p10 = scmp.lt.s32.totalorder %s204_s30, %s1160_s1 }
  0xc2   : > { %p732_p13 = scmp.ne.s32.totalorder %s204_s30, %s731_s17  ;;  %p735_p11 = scmp.lt.s32.totalorder %s940_s16, %s731_s17 }
  0xc4   : > { %p736_p0 = por %p735_p11, %p734_p10 }
  0xc6   : > { %p737_p12 = pnand %p736_p0, %p732_p13 }
  0xc8   : > { %740 = shalt.err (!%p737_p12)  }
  0xc9   : > { %s741_s24 = scalar_lea.vmem %s215_s8, 16  ;;  %p746_p2 = scmp.lt.s32.totalorder %s215_s8, %s920_s26 }
  0xca   : > { %p742_p1 = scmp.ne.s32.totalorder %s215_s8, %s741_s24  ;;  %p747_p3 = scmp.lt.s32.totalorder %s949_s27, %s741_s24 }
  0xcc   : > { %p748_p5 = por %p747_p3, %p746_p2 }
  0xce   : > { %p749_p7 = pnand %p748_p5, %p742_p1 }
  0xd0   : > { %752 = shalt.err (!%p749_p7)  }
  0xd1   : > { %217 = dma.hbm_to_vmem [thread:$0]  %s204_s30, 16, %s215_s8, [#allocation3 + $0x7] }
  0xd2   : > { %s51_s28 = scalar_lea.vmem [#allocation6], %s916_s23  ;;  %s1077_s29 = smov 0  }
  0xd3 LB: >> { %p224_p8 = scmp.lt.s32.totalorder %s843_s29, 0  ;;  %s225_s0 = ssub.s32 0, %s843_s29  ;;  %s843_s29 = sphi %s1077_s29, %s223_s29  }
  0xd4   : >> { %s473_s4 = smin.u32 %s843_s29, %s225_s0 }
  0xd5   : >> { %s227_s11 = sand.u32 7, %s473_s4  }
  0xd6   : >> { %s228_s6 = ssub.s32 0, %s227_s11 }
  0xd7   : >> { %s1193_s6 = smov (!%p224_p8, %s228_s6), %s227_s11 }
  0xd8   : >> { %p475_p9 = scmp.lt.s32.totalorder %s1193_s6, 0  ;;  %s234_s10 = sadd.s32 8, %s1193_s6 }
  0xda   : >> { %s1195_s10 = smov (!%p475_p9, %s234_s10), %s1193_s6 }
  0xdb   : >> { %s236_s8 = scalar_lea.sflag [#allocation3], %s1195_s10 }
  0xdc   : >> { %823 = dma.done.wait %s236_s8, 16 }
  0xdd   : >> { %824 = vsyncadd %s236_s8, 4294967280  ;;  %s1086_s3 = sadd.s32 8, %s843_s29  ;;  %s393_s24 = scalar_lea.vmem [#allocation2], %s843_s29 }
  0xde   : >> { %p526_p13 = scmp.lt.s32.totalorder %s1086_s3, 8  ;;  %s245_s25 = sadd.s32 %s912_s22, %s1086_s3 }
  0xdf   : >> { %p251_p10 = scmp.lt.s32.totalorder %s1086_s3, 0  ;;  %s252_s30 = ssub.s32 0, %s1086_s3 }
  0xe0   : >> { %s517_s5 = scalar_select %p526_p13, [#allocation5], [#allocation28] }
  0xe1   : >> { %s1197_s25 = smov (!%p526_p13, %s245_s25), 0  ;;  %s482_s7 = smin.u32 %s252_s30, %s1086_s3 }
  0xe2   : >> { %s246_s17 = sld [smem:[%s517_s5 + %s1197_s25]]  ;;  %s254_s9 = sand.u32 7, %s482_s7  }
  0xe3   : >> { %s394_s0 = scalar_lea.vmem %s393_s24, 8 [#allocation2]  ;;  %s255_s4 = ssub.s32 0, %s254_s9 }
  0xe4   : >> { %s1199_s4 = smov (!%p251_p10, %s255_s4), %s254_s9  ;;  %s274_s11 = sshll.u32 %s394_s0, 4  ;;  %s275_s11 = int_to_ptr.vmem [resolvable:$true] %s274_s11 }
  0xe5   : >> { %p484_p11 = scmp.lt.s32.totalorder %s1199_s4, 0  ;;  %s261_s6 = sadd.s32 8, %s1199_s4 }
  0xe7   : >> { %s1201_s6 = smov (!%p484_p11, %s261_s6), %s1199_s4 }
  0xe8   : >> { %p247_p0 = scmp.gt.s32.totalorder %s246_s17, 0  ;;  %p477_p12 = scmp.lt.s32.totalorder %s246_s17, 63 }
  0xe9   : >> { %s266_s30 = scalar_lea.sflag [#allocation3], %s1201_s6 }
  0xea   : >> { %s1203_s17 = smov (!%p247_p0, %s246_s17), 0 }
  0xeb   : >> { %s1205_s17 = smov (!%p477_p12, %s1203_s17), 63 }
  0xec   : >> { %s485_s10 = sshll.u32 %s1205_s17, 4 }
  0xed   : >> { %s264_s5 = scalar_lea.hbm %s1160_s1, %s485_s10 }
  0xee   : >> { %s753_s7 = scalar_lea.hbm %s264_s5, 16  ;;  %p758_p5 = scmp.lt.s32.totalorder %s264_s5, %s1160_s1 }
  0xef   : >> { %p754_p1 = scmp.ne.s32.totalorder %s264_s5, %s753_s7  ;;  %p759_p7 = scmp.lt.s32.totalorder %s940_s16, %s753_s7 }
  0xf1   : >> { %p755_p2 = pnand %p754_p1, %p526_p13  ;;  %p760_p8 = por %p759_p7, %p758_p5 }
  0xf3   : >> { %p756_p3 = pneg %p755_p2 }
  0xf5   : >> { %p761_p9 = pnand %p760_p8, %p756_p3 }
  0xf7   : >> { %764 = shalt.err (!%p761_p9)  }
  0xf8   : >> { %s765_s0 = scalar_lea.vmem %s275_s11, 16  ;;  %p772_p12 = scmp.lt.s32.totalorder %s275_s11, %s920_s26 }
  0xf9   : >> { %p766_p10 = scmp.ne.s32.totalorder %s275_s11, %s765_s0  ;;  %p773_p6 = scmp.lt.s32.totalorder %s949_s27, %s765_s0 }
  0xfb   : >> { %p767_p11 = pnand %p766_p10, %p526_p13  ;;  %p774_p1 = por %p773_p6, %p772_p12 }
  0xfd   : >> { %p768_p0 = pneg %p767_p11 }
  0xff   : >> { %p775_p2 = pnand %p774_p1, %p768_p0 }
 0x101   : >> { %778 = shalt.err (!%p775_p2)  }
 0x102   : >> { %519 = dma.hbm_to_vmem [thread:$0]  (%p526_p13), %s264_s5, 16, %s275_s11, %s266_s30 }
 0x103   : >> { %s223_s29 = sadd.s32 1, %s843_s29  }
 0x104   : >> { %p220_p3 = scmp.ge.s32.totalorder %s223_s29, 8  }
 0x105   : > { %v278_v0 = vld [vmem:[#allocation2] sm:$0xff] (%p220_p3)  ;;  %s487_s17 = sshll.u32 (%p220_p3), %s839_s14, 7  ;;  %s295_s3 = sshll.u32 (%p220_p3), %s51_s28, 4  ;;  %s296_s3 = int_to_ptr.vmem [resolvable:$true] %s295_s3 }
 0x106   : > { %222 = sbr.rel (!%p220_p3) target bundleno = 211 (0xd3), region = 124  ;;  %v279_v1 = vmul.f32 (%p220_p3), 11.313708, %v278_v0  ;;  %s1121_s10 = scalar_lea.hbm (%p220_p3), %s1161_s2, %s487_s17 }
 0x107   : > { %s282_s29 = scalar_lea.sflag (%p220_p3), [#allocation7], %s49_s21  ;;  %s779_s22 = scalar_lea.vmem (%p220_p3), %s296_s3, 128 }
 0x108   : > { %280 = vst [vmem:[%s51_s28] sm:$0xff] (%p220_p3), %v279_v1  ;;  %p780_p6 = scmp.ne.s32.totalorder (%p220_p3), %s296_s3, %s779_s22  ;;  %s854_s26 = smov (%p220_p3), [#allocation6]  }
 0x109   : > { %s783_s16 = sshll.u32 (%p220_p3), %s854_s26, 4  ;;  %s784_s16 = int_to_ptr.vmem [resolvable:$false] %s783_s16 }
 0x10a   : > { %p781_p13 = pnand (%p220_p3), %p780_p6, %p901_p4  ;;  %s785_s27 = scalar_lea.vmem (%p220_p3), %s784_s16, 256 }
 0x10b   : > { %p786_p7 = scmp.lt.s32.totalorder %s296_s3, %s784_s16  ;;  %p787_p8 = scmp.lt.s32.totalorder %s785_s27, %s779_s22 }
 0x10c   : > { %p782_p5 = pneg %p781_p13 }
 0x10d   : > { %p788_p9 = por %p787_p8, %p786_p7 }
 0x10f   : > { %p789_p10 = pnand %p788_p9, %p782_p5 }
 0x111   : > { %792 = shalt.err (!%p789_p10)
}
 0x112   : > { %s793_s23 = scalar_lea.hbm %s1121_s10, 128  ;;  %s797_s11 = scalar_lea.hbm %s1161_s2, 256 }
 0x113   : > { %p794_p11 = scmp.ne.s32.totalorder %s1121_s10, %s793_s23  ;;  %p798_p1 = scmp.lt.s32.totalorder %s1121_s10, %s1161_s2 }
 0x114   : > { %p799_p2 = scmp.lt.s32.totalorder %s797_s11, %s793_s23 }
 0x115   : > { %p795_p0 = pnand %p794_p11, %p901_p4 }
 0x116   : > { %p800_p3 = por %p799_p2, %p798_p1 }
 0x117   : > { %p796_p12 = pneg %p795_p0 }
 0x119   : > { %p801_p6 = pnand %p800_p3, %p796_p12 }
 0x11b   : > { %804 = shalt.err (!%p801_p6)
}
 0x11c   : > { %520 = dma.vmem_to_hbm [thread:$0]  (%p901_p4), %s296_s3, 128, %s1121_s10, %s282_s29  }
 0x11d PF: > { %p527_p13 = scmp.ge.s32.totalorder %s839_s14, 1  ;;  %s307_s5 = sand.u32 1, %s831_s12  }
 0x11e   : > { %p1166_p5 = scmp.ne.s32.totalorder %s1163_s20, 0  ;;  %s308_s30 = scalar_lea.sflag [#allocation7], %s307_s5 }
 0x120   : > { %p523_p7 = pnand %p527_p13, %p1166_p5 }
 0x122   : > { %p524_p8 = pneg %p523_p7 }
 0x124   : > { %826 = dma.done.wait (%p524_p8), %s308_s30, 128  }
 0x125   : > { %828 = vsyncadd (%p524_p8), %s308_s30, 4294967168  ;;  %p16_p9 = scmp.ge.s32.totalorder %s890_s15, 3   ;;  %s1167_s12 = smov %s835_s13 }
 0x126   : > { %s1168_s13 = smov %s899_s18  ;;  %s1169_s14 = smov %s890_s15 }
 0x127   :  { %18 = sbr.rel (!%p16_p9) target bundleno = 8 (0x8), region = 135 }
 0x12c   :  { %313 = vsyncpa [#allocation7], 1 }
 0x12d   :  { %315 = vsyncpa [#allocation7 + $0x1], 1 }
 0x12e   :  { %316 = vsyncmov [#allocation3] }
 0x131   :  { %s317_s14 = vpop.sfrf %316 }
 0x132   :  { %p490_p4 = scmp.ne.s32.totalorder %s317_s14, 0 }
 0x134   :  { %321 = shalt.err (%p490_p4)  }
 0x135   :  { %323 = vsyncmov [#allocation3 + $0x1] }
 0x138   :  { %s324_s19 = vpop.sfrf %323 }
 0x139   :  { %p491_p10 = scmp.ne.s32.totalorder %s324_s19, 0 }
 0x13b   :  { %328 = shalt.err (%p491_p10)  }
 0x13c   :  { %330 = vsyncmov [#allocation3 + $0x2] }
 0x13f   :  { %s331_s20 = vpop.sfrf %330 }
 0x140   :  { %p492_p11 = scmp.ne.s32.totalorder %s331_s20, 0 }
 0x142   :  { %335 = shalt.err (%p492_p11)  }
 0x143   :  { %337 = vsyncmov [#allocation3 + $0x3] }
 0x146   :  { %s338_s7 = vpop.sfrf %337 }
 0x147   :  { %p493_p0 = scmp.ne.s32.totalorder %s338_s7, 0 }
 0x149   :  { %342 = shalt.err (%p493_p0)  }
 0x14a   :  { %344 = vsyncmov [#allocation3 + $0x4] }
 0x14d   :  { %s345_s15 = vpop.sfrf %344 }
 0x14e   :  { %p494_p12 = scmp.ne.s32.totalorder %s345_s15, 0 }
 0x150   :  { %349 = shalt.err (%p494_p12)  }
 0x151   :  { %351 = vsyncmov [#allocation3 + $0x5] }
 0x154   :  { %s352_s1 = vpop.sfrf %351 }
 0x155   :  { %p495_p1 = scmp.ne.s32.totalorder %s352_s1, 0 }
 0x157   :  { %356 = shalt.err (%p495_p1)  }
 0x158   :  { %358 = vsyncmov [#allocation3 + $0x6] }
 0x15b   :  { %s359_s2 = vpop.sfrf %358 }
 0x15c   :  { %p496_p2 = scmp.ne.s32.totalorder %s359_s2, 0 }
 0x15e   :  { %363 = shalt.err (%p496_p2)  }
 0x15f   :  { %365 = vsyncmov [#allocation3 + $0x7] }
 0x162   :  { %s366_s12 = vpop.sfrf %365 }
 0x163   :  { %p497_p3 = scmp.ne.s32.totalorder %s366_s12, 0 }
 0x165   :  { %370 = shalt.err (%p497_p3)  }

</bundles_post_ra>
